<compile_context>
chip_gen: v7x
topology: tpu7x:2x2x1
jax: 0.10.0
libtpu: 0.0.40
codegen_flags: <defaults>
</compile_context>

<pallas_src>
import functools
import math

import jax
import jax.numpy as jnp
from jax import lax
from jax.experimental import pallas as pl
from jax.experimental.pallas import tpu as pltpu

_LANE = 128
_VMEM_BUDGET = 26 * 1024 * 1024      # double-buffered working-set target
_VMEM_LIMIT_BYTES = 48 * 1024 * 1024  # < v7x 64 MiB physical, > v5e 16 MiB default


def _identity_decoder(v):
    # Stand-in for the user-supplied weight_decoder / bias_decoder.
    return v


def _round_up(x, m):
    return ((x + m - 1) // m) * m


def _largest_dividing_tile(dim128, cap):
    """Largest multiple of 128 that divides `dim128` (a multiple of 128) and is
    <= cap.  128 always qualifies."""
    best = _LANE
    t = _LANE
    while t <= min(dim128, cap):
        if dim128 % t == 0:
            best = t
        t += _LANE
    return best


def _linear_kernel(x_ref, w_ref, b_ref, o_ref, acc_ref, *,
                   use_straight_through, compress_bias,
                   weight_decoder, bias_decoder, matmul_dtype):
    k = pl.program_id(2)

    @pl.when(k == 0)
    def _():
        acc_ref[...] = jnp.zeros_like(acc_ref)

    x = x_ref[...]                       # (tm, tk)
    w = w_ref[...]                       # (tn, tk)  -- stored (Out, In) layout

    if use_straight_through:
        # StraightThrough.forward == torch.round (forward semantics only).
        # Round/decode happen in the stored dtype, before any matmul downcast.
        w = jnp.round(w)
    w = weight_decoder(w)

    if matmul_dtype is not None:
        x = x.astype(matmul_dtype)
        w = w.astype(matmul_dtype)

    # x @ W.T without materializing a transpose: contract dim 1 of both.
    acc_ref[...] += lax.dot_general(
        x, w,
        dimension_numbers=(((1,), (1,)), ((), ())),
        preferred_element_type=jnp.float32)

    @pl.when(k == pl.num_programs(2) - 1)
    def _():
        b = b_ref[...]                   # (1, tn)
        if use_straight_through and compress_bias:
            b = jnp.round(b)
        b = bias_decoder(b)
        o_ref[...] = (acc_ref[...] + b.astype(jnp.float32)).astype(o_ref.dtype)


def _choose_nk_tiles(out_features, in_features):
    """tn/tk chosen once per layer (independent of batch): multiples of 128 that
    divide the 128-padded dims, sized against the VMEM budget assuming the
    largest M tile we ever use (512)."""
    out128 = _round_up(out_features, _LANE)
    in128 = _round_up(in_features, _LANE)
    tn = _largest_dividing_tile(out128, 512)
    tm_nom = 512
    fixed = 3 * tm_nom * tn * 4                      # 2 out buffers + f32 acc
    tk_budget = (_VMEM_BUDGET - fixed) // (2 * (tm_nom + tn) * 4)
    tk_cap = max(_LANE, (tk_budget // _LANE) * _LANE)
    tk = _largest_dividing_tile(in128, min(2048, tk_cap))
    return tn, tk, out128, in128


def _m_alignment(matmul_dtype, fallback_dtype):
    dt = matmul_dtype if matmul_dtype is not None else fallback_dtype
    itemsize = jnp.dtype(dt).itemsize
    if itemsize == 1:
        return 32
    if itemsize == 2:
        return 16
    return 8


def make_pallas_linear(weight, bias=None, *,
                       use_straight_through=False, compress_bias=False,
                       weight_decoder=_identity_decoder,
                       bias_decoder=_identity_decoder,
                       matmul_dtype=jnp.bfloat16,
                       param_store_dtype=None):
    """Pre-pads (and optionally narrows) the parameters once and returns an
    apply(x) closure.  weight: (Out, In); bias: (Out,) or None."""
    out_features, in_features = weight.shape
    has_bias = bias is not None
    if not has_bias:
        bias = jnp.zeros((out_features,), dtype=weight.dtype)

    if param_store_dtype is not None:
        # Narrower stored weights halve/quarter weight HBM traffic (the roofline
        # for small-batch Linear); round/decode then run on the narrowed values.
        weight = weight.astype(param_store_dtype)
        bias = bias.astype(param_store_dtype)

    tn, tk, out_pad, in_pad = _choose_nk_tiles(out_features, in_features)

    # Pad parameters ONCE (they are layer constants).
    w_p = jnp.pad(weight, ((0, out_pad - out_features), (0, in_pad - in_features)))
    b_p = jnp.pad(bias, (0, out_pad - out_features)).reshape(1, out_pad)

    kernel = functools.partial(
        _linear_kernel,
        use_straight_through=use_straight_through,
        compress_bias=compress_bias and has_bias,
        weight_decoder=weight_decoder,
        bias_decoder=bias_decoder if has_bias else _identity_decoder,
        matmul_dtype=matmul_dtype,
    )

    def apply(x):
        batch, in_x = x.shape
        assert in_x == in_features
        out_dtype = x.dtype

        # --- M tile: single block for small batch (W streamed exactly once),
        # sublane-aligned to the packed compute dtype.
        m_align = _m_alignment(matmul_dtype, out_dtype)
        tm = _round_up(batch, m_align) if batch <= 512 else 256
        b_pad = _round_up(batch, tm)
        grid_m = b_pad // tm

        # --- v7x megacore: ensure >=2 blocks on some "parallel" axis.
        tn_eff = tn
        if grid_m == 1 and out_pad // tn_eff == 1 and tn_eff >= 2 * _LANE:
            tn_eff = _largest_dividing_tile(out_pad, tn_eff // 2)
        grid_n = out_pad // tn_eff
        grid_k = in_pad // tk
        grid = (grid_m, grid_n, grid_k)

        # Only x is padded per call (zero-padded K cols contribute nothing).
        x_p = jnp.pad(x, ((0, b_pad - batch), (0, in_pad - in_features)))

        x_bytes = jnp.dtype(x.dtype).itemsize
        w_bytes = jnp.dtype(w_p.dtype).itemsize
        o_bytes = jnp.dtype(out_dtype).itemsize
        cost = pl.CostEstimate(
            flops=2 * b_pad * in_pad * out_pad,
            transcendentals=0,
            bytes_accessed=(x_bytes * b_pad * in_pad * grid_n      # x re-streamed per N tile
                            + w_bytes * out_pad * in_pad * grid_m  # W re-streamed per M tile
                            + o_bytes * b_pad * out_pad
                            + w_bytes * out_pad))

        out_p = pl.pallas_call(
            kernel,
            out_shape=jax.ShapeDtypeStruct((b_pad, out_pad), out_dtype),
            grid_spec=pltpu.PrefetchScalarGridSpec(
                num_scalar_prefetch=0,
                grid=grid,
                in_specs=[
                    pl.BlockSpec((tm, tk), lambda i, j, k: (i, k)),      # x tile
                    pl.BlockSpec((tn_eff, tk), lambda i, j, k: (j, k)),  # W tile (Out, In)
                    pl.BlockSpec((1, tn_eff), lambda i, j, k: (0, j)),   # bias tile
                ],
                out_specs=pl.BlockSpec((tm, tn_eff), lambda i, j, k: (i, j)),
                scratch_shapes=[pltpu.VMEM((tm, tn_eff), jnp.float32)],
            ),
            compiler_params=pltpu.CompilerParams(
                dimension_semantics=("parallel", "parallel", "arbitrary"),
                vmem_limit_bytes=_VMEM_LIMIT_BYTES),
            cost_estimate=cost,
        )(x_p, w_p, b_p)

        return out_p[:batch, :out_features]

    return apply


def pallas_linear(x, weight, bias=None, **kwargs):
    """One-shot convenience wrapper (pads the weight per call; prefer
    make_pallas_linear for repeated use of the same parameters)."""
    return make_pallas_linear(weight, bias, **kwargs)(x)


def init_linear_params(key, in_features, out_features, dtype=jnp.float32):
    """Matches nn.Linear.reset_parameters: kaiming_uniform_(a=sqrt(5)) on weight
    -> U(-1/sqrt(fan_in), 1/sqrt(fan_in)); bias -> same bound."""
    kw, kb = jax.random.split(key)
    bound = 1.0 / math.sqrt(in_features) if in_features > 0 else 0.0
    weight = jax.random.uniform(kw, (out_features, in_features), dtype,
                                minval=-bound, maxval=bound)
    bias = jax.random.uniform(kb, (out_features,), dtype,
                              minval=-bound, maxval=bound)
    return weight, bias


if __name__ == "__main__":
    key = jax.random.PRNGKey(0)
    kx, kp = jax.random.split(key)

    # Small shapes that still exercise padding and >1 N tile.
    batch, in_features, out_features = 8, 320, 192
    x = jax.random.normal(kx, (batch, in_features), dtype=jnp.float32)
    weight, bias = init_linear_params(kp, in_features, out_features)

    # 1) Default bf16-MXU path (f32 accumulate): loose tolerance vs f32 ref.
    apply_bf16 = make_pallas_linear(weight, bias)              # matmul_dtype=bf16
    out_bf16 = jax.block_until_ready(apply_bf16(x))
    ref = x @ weight.T + bias
    assert out_bf16.shape == (batch, out_features)
    assert jnp.allclose(out_bf16, ref, atol=5e-2, rtol=5e-2)

    # 2) Bit-exact f32 path (explicit opt-in): tight tolerance.
    apply_f32 = make_pallas_linear(weight, bias, matmul_dtype=None)
    out_f32 = jax.block_until_ready(apply_f32(x))
    assert jnp.allclose(out_f32, ref, atol=1e-5, rtol=1e-5)

    # 3) Straight-through (+ compressed bias): scale params so rounding is
    #    non-trivial; use the f32 path (bf16 is only integer-exact up to |256|).
    w_st, b_st = weight * 20.0, bias * 20.0
    apply_st = make_pallas_linear(w_st, b_st, use_straight_through=True,
                                  compress_bias=True, matmul_dtype=None)
    out_st = jax.block_until_ready(apply_st(x))
    ref_st = x @ jnp.round(w_st).T + jnp.round(b_st)
    assert jnp.allclose(out_st, ref_st, atol=1e-5, rtol=1e-5)

    print("KERNEL_OK")
</pallas_src>

<mosaic_0001>
module attributes {stable_mosaic.version = 11 : i64} {
  func.func @_linear_kernel(%arg0: i32, %arg1: i32, %arg2: i32, %arg3: memref<16x384xf32, #tpu.memory_space<vmem>>, %arg4: memref<128x384xf32, #tpu.memory_space<vmem>>, %arg5: memref<1x128xf32, #tpu.memory_space<vmem>>, %arg6: memref<16x128xf32, #tpu.memory_space<vmem>>, %arg7: memref<16x128xf32, #tpu.memory_space<vmem>>) attributes {dimension_semantics = [#tpu.dimension_semantics<parallel>, #tpu.dimension_semantics<parallel>, #tpu.dimension_semantics<arbitrary>], iteration_bounds = array<i64: 1, 2, 1>, scalar_prefetch = 0 : i64, scratch_operands = 1 : i64, tpu.core_type = #tpu.core_type<tc>, window_params = [{transform_indices = @transform_0, window_bounds = array<i64: 16, 384>}, {transform_indices = @transform_1, window_bounds = array<i64: 128, 384>}, {transform_indices = @transform_2, window_bounds = array<i64: 1, 128>}, {transform_indices = @transform_3, window_bounds = array<i64: 16, 128>}]} {
    %c0_i32 = arith.constant 0 : i32
    %0 = arith.cmpi eq, %arg2, %c0_i32 : i32
    %1 = arith.extui %0 : i1 to i32
    %c0_i32_0 = arith.constant 0 : i32
    %2 = arith.cmpi ne, %1, %c0_i32_0 : i32
    scf.if %2 {
      %cst_10 = arith.constant 0.000000e+00 : f32
      %14 = vector.broadcast %cst_10 : f32 to vector<16x128xf32>
      %c0_11 = arith.constant 0 : index
      %c0_12 = arith.constant 0 : index
      %15 = vector.load %arg7[%c0_11, %c0_12] : memref<16x128xf32, #tpu.memory_space<vmem>>, vector<16x128xf32>
      tpu.vector_store %arg7[%c0_11, %c0_12], %14 {strides = array<i32>} : memref<16x128xf32, #tpu.memory_space<vmem>>, vector<16x128xf32>,
    } else {
    }
    %c0 = arith.constant 0 : index
    %c0_1 = arith.constant 0 : index
    %3 = vector.load %arg3[%c0, %c0_1] : memref<16x384xf32, #tpu.memory_space<vmem>>, vector<16x384xf32>
    %c0_2 = arith.constant 0 : index
    %c0_3 = arith.constant 0 : index
    %4 = vector.load %arg4[%c0_2, %c0_3] : memref<128x384xf32, #tpu.memory_space<vmem>>, vector<128x384xf32>
    %5 = arith.truncf %3 : vector<16x384xf32> to vector<16x384xbf16>
    %6 = arith.truncf %4 : vector<128x384xf32> to vector<128x384xbf16>
    %c0_4 = arith.constant 0 : index
    %c0_5 = arith.constant 0 : index
    %7 = vector.load %arg7[%c0_4, %c0_5] : memref<16x128xf32, #tpu.memory_space<vmem>>, vector<16x128xf32>
    %cst = arith.constant dense<0.000000e+00> : vector<16x128xf32>
    %8 = tpu.matmul %5, %6, %cst {dimension_numbers = #tpu.dot_dimension_numbers<[1], [1], [0], [0], [0, 0, 1, 0], [], []>} : vector<16x384xbf16>, vector<128x384xbf16>, vector<16x128xf32> -> vector<16x128xf32>
    %9 = arith.addf %7, %8 : vector<16x128xf32>
    %c0_6 = arith.constant 0 : index
    %c0_7 = arith.constant 0 : index
    %10 = vector.load %arg7[%c0_6, %c0_7] : memref<16x128xf32, #tpu.memory_space<vmem>>, vector<16x128xf32>
    tpu.vector_store %arg7[%c0_6, %c0_7], %9 {strides = array<i32>} : memref<16x128xf32, #tpu.memory_space<vmem>>, vector<16x128xf32>,
    %c0_i32_8 = arith.constant 0 : i32
    %11 = arith.cmpi eq, %arg2, %c0_i32_8 : i32
    %12 = arith.extui %11 : i1 to i32
    %c0_i32_9 = arith.constant 0 : i32
    %13 = arith.cmpi ne, %12, %c0_i32_9 : i32
    scf.if %13 {
      %c0_10 = arith.constant 0 : index
      %c0_11 = arith.constant 0 : index
      %14 = vector.load %arg5[%c0_10, %c0_11] : memref<1x128xf32, #tpu.memory_space<vmem>>, vector<1x128xf32>
      %c0_12 = arith.constant 0 : index
      %c0_13 = arith.constant 0 : index
      %15 = vector.load %arg7[%c0_12, %c0_13] : memref<16x128xf32, #tpu.memory_space<vmem>>, vector<16x128xf32>
      %16 = vector.broadcast %14 : vector<1x128xf32> to vector<16x128xf32>
      %17 = arith.addf %15, %16 : vector<16x128xf32>
      %c0_14 = arith.constant 0 : index
      %c0_15 = arith.constant 0 : index
      %18 = vector.load %arg6[%c0_14, %c0_15] : memref<16x128xf32, #tpu.memory_space<vmem>>, vector<16x128xf32>
      tpu.vector_store %arg6[%c0_14, %c0_15], %17 {strides = array<i32>} : memref<16x128xf32, #tpu.memory_space<vmem>>, vector<16x128xf32>,
    } else {
    }
    return
  }
  func.func @transform_0(%arg0: i32, %arg1: i32, %arg2: i32) -> (i32, i32) {
    %c0_i32 = arith.constant 0 : i32
    return %arg0, %arg2 : i32, i32
  }
  func.func @transform_1(%arg0: i32, %arg1: i32, %arg2: i32) -> (i32, i32) {
    %c0_i32 = arith.constant 0 : i32
    return %arg1, %arg2 : i32, i32
  }
  func.func @transform_2(%arg0: i32, %arg1: i32, %arg2: i32) -> (i32, i32) {
    %c0_i32 = arith.constant 0 : i32
    %c0_i32_0 = arith.constant 0 : i32
    return %c0_i32, %arg1 : i32, i32
  }
  func.func @transform_3(%arg0: i32, %arg1: i32, %arg2: i32) -> (i32, i32) {
    %c0_i32 = arith.constant 0 : i32
    return %arg0, %arg1 : i32, i32
  }
}

</mosaic_0001>

<bundles_post_ra>
// kernel: tpu_custom_call.1
= control target key start
LH: loop header
LB: loop body
LE: loop exit
PB: predicated region body
PF: predicated region fallthrough
CT: control target
= control target key end

     0   :  { %8 = vsyncpa [#allocation4], 0  ;;  %s1173_s0 = inlined_call_operand.hbm [shape: f32[16,384], index: 0, kind: input, shape index: {}]   ;;  %s1174_s1 = inlined_call_operand.hbm [shape: f32[256,384], index: 1, kind: input, shape index: {}]   ;;  %s1175_s2 = inlined_call_operand.vmem [shape: f32[1,256], index: 2, kind: input, shape index: {}]   ;;  %s1176_s3 = inlined_call_operand.hbm [shape: f32[16,256], index: 3, kind: output, shape index: {}]  }
   0x1   :  { %9 = vsyncpa [#allocation7], 0 }
   0x2   :  { %11 = vsyncpa [#allocation7 + $0x1], 0 }
   0x3   :  { %12 = vsyncpa [#allocation5], 0 }
   0x4   :  { %14 = vsyncpa [#allocation5 + $0x1], 0  ;;  %s889_s12 = smov 0   ;;  %s891_s13 = smov 0  }
   0x5   :  { %s893_s14 = smov 0   ;;  %s895_s15 = smov 0  }
   0x6   :  { %s897_s16 = smov 0   ;;  %s899_s17 = smov 0  }
   0x7 LB: > { %s585_s18 = sadd.s32 4294967295, %s857_s17   ;;  %s586_s19 = sadd.s32 4294967294, %s857_s17   ;;  %s857_s17 = sphi %s899_s17, %s20_s17   ;;  %s853_s16 = sphi %s897_s16, %s1199_s16   ;;  %s849_s15 = sphi %s895_s15, %s1198_s15   ;;  %s845_s14 = sphi %s893_s14, %s1197_s14   ;;  %s841_s13 = sphi %s891_s13, %s1196_s13   ;;  %s837_s12 = sphi %s889_s12, %s1195_s12  }
   0x8   : > { %p89_p0 = scmp.ne.s32.totalorder %s841_s13, %s837_s12  ;;  %p923_p1 = scmp.eq.s32.totalorder %s585_s18, 0 }
   0x9   : > { %p927_p2 = scmp.eq.s32.totalorder %s585_s18, 1  ;;  %p147_p3 = scmp.eq.s32.totalorder %s586_s19, 1 }
   0xa   : > { %s1181_s20 = scalar_select %p923_p1, 1, 0 }
   0xb   : > { %s1182_s21 = scalar_select %p927_p2, 1, 0 }
   0xc   : > { %p933_p4 = por %p923_p1, %p89_p0  ;;  %p587_p5 = scmp.ge.s32.totalorder %s857_s17, 1 }
   0xd   : > { %p938_p6 = por %p147_p3, %p89_p0  ;;  %p154_p7 = scmp.lt.s32.totalorder %s857_s17, 3 }
   0xe   : > { %s1183_s22 = scalar_select %p933_p4, 1, 0 }
   0xf   : > { %s1184_s23 = scalar_select %p938_p6, 1, 0 }
  0x10   : > { %p943_p8 = pnand %p587_p5, %p154_p7  ;;  %s859_s25 = smov [#allocation3]  }
  0x11   : > { %s172_s26 = sshll.u32 %s859_s25, 4  ;;  %s35_s28 = sadd.s32 1, %s853_s16  ;;  %s173_s26 = int_to_ptr.vmem [resolvable:$true] %s172_s26 }
  0x12   : > { %s1185_s24 = scalar_select %p943_p8, 1, 0 }
  0x13   : > { %p641_p9 = pneg %p943_p8  ;;  %s713_s4 = scalar_lea.hbm %s1173_s0, 768 }
  0x14   : > { %p714_p12 = scmp.ne.s32.totalorder %s1173_s0, %s713_s4  ;;  %p720_p5 = scmp.lt.u32.totalorder %s713_s4, %s1173_s0 }
  0x15   : > { %p952_p11 = pnand %p641_p9, %p923_p1 }
  0x17   : > { %p715_p13 = pneg %p952_p11 }
  0x19   : > { %p716_p0 = pnand %p715_p13, %p714_p12 }
  0x1b   : > { %p717_p3 = pneg %p716_p0 }
  0x1d   : > { %p722_p7 = pnand %p720_p5, %p717_p3 }
  0x1f   : > { %725 = shalt.err (!%p722_p7)
}
  0x20   : > { %s726_s9 = scalar_lea.vmem %s173_s26, 768  ;;  %p734_p4 = scmp.lt.s32.totalorder %s173_s26, %s173_s26 }
  0x21   : > { %p727_p9 = scmp.ne.s32.totalorder %s173_s26, %s726_s9  ;;  %p735_p1 = scmp.lt.s32.totalorder %s726_s9, %s726_s9 }
  0x23   : > { %p729_p10 = pnand %p727_p9, %p715_p13  ;;  %p736_p8 = por %p735_p1, %p734_p4 }
  0x25   : > { %p730_p6 = pneg %p729_p10 }
  0x27   : > { %p737_p2 = pnand %p736_p8, %p730_p6 }
  0x29   : > { %740 = shalt.err (!%p737_p2)
}
  0x2a   : > { %s860_s10 = smov 384   ;;  %s861_s11 = smov 24  }
  0x2b   : > { %644 = dma.hbm_to_vmem [thread:$0]  (!%p952_p11), %s1173_s0, 768, %s173_s26, [#allocation4], %s860_s10, %s860_s10, %s861_s11  }
  0x2c   : > { %p37_p1 = scmp.ge.s32.totalorder %s35_s28, 2  ;;  %s76_s25 = sadd.s32 1, %s845_s14 }
  0x2d   : > { %p83_p2 = scmp.ne.s32.totalorder %s845_s14, %s841_s13  ;;  %p84_p4 = scmp.eq.s32.totalorder %s857_s17, 0 }
  0x2e   : > { %s1201_s28 = smov (%p37_p1, %s35_s28), 0  ;;  %p1187_p8 = scmp.ne.s32.totalorder %s1182_s21, 0 }
  0x2f   : > { %p85_p6 = por %p84_p4, %p83_p2  ;;  %s71_s27 = ssub.s32 %s853_s16, %s1201_s28 }
  0x30   : > { %p984_p10 = por %p1187_p8, %p83_p2  ;;  %p654_p12 = scmp.lt.s32.totalorder %s857_s17, 2 }
  0x31   : > { %p74_p13 = scmp.eq.s32.totalorder %s71_s27, 0  ;;  %s186_s30 = sand.u32 1, %s845_s14  }
  0x32   : > { %s630_s4 = smul.u32 384, %s186_s30  ;;  %p996_p11 = pnand %p654_p12, %p85_p6 }
  0x33   : > { %s993_s5 = scalar_select %p74_p13, %s845_s14, %s76_s25  }
  0x34   : > { %s631_s26 = smul.u32 6144, %s853_s16  ;;  %s190_s6 = scalar_lea.vmem [#allocation6], %s630_s4 }
  0x35   : > { %s200_s7 = sshll.u32 %s190_s6, 4  ;;  %s1007_s19 = scalar_lea.sflag [#allocation7], %s186_s30  ;;  %s1005_s7 = int_to_ptr.vmem [resolvable:$true] %s200_s7 }
  0x36   : > { %s1003_s18 = scalar_lea.hbm %s1174_s1, %s631_s26  ;;  %p743_p3 = pneg %p996_p11 }
  0x37   : > { %s741_s25 = scalar_lea.hbm %s1003_s18, 6144  ;;  %s746_s26 = scalar_lea.hbm %s1174_s1, 12288 }
  0x38   : > { %p742_p0 = scmp.ne.s32.totalorder %s1003_s18, %s741_s25  ;;  %p747_p9 = scmp.lt.u32.totalorder %s1003_s18, %s1174_s1 }
  0x39   : > { %p748_p1 = scmp.lt.u32.totalorder %s746_s26, %s741_s25  ;;  %p750_p4 = scmp.lt.u32.totalorder %s741_s25, %s1003_s18 }
  0x3a   : > { %p744_p5 = pnand %p743_p3, %p742_p0 }
  0x3b   : > { %p749_p2 = por %p748_p1, %p747_p9 }
  0x3c   : > { %p745_p7 = pneg %p744_p5 }
  0x3d   : > { %p751_p6 = por %p750_p4, %p749_p2 }
  0x3f   : > { %p752_p8 = pnand %p751_p6, %p745_p7 }
  0x41   : > { %755 = shalt.err (!%p752_p8)
}
  0x42   : > { %s756_s30 = scalar_lea.vmem %s1005_s7, 6144  ;;  %s862_s21 = smov [#allocation6]  }
  0x43   : > { %p757_p12 = scmp.ne.s32.totalorder %s1005_s7, %s756_s30  ;;  %s761_s27 = sshll.u32 %s862_s21, 4  ;;  %s762_s27 = int_to_ptr.vmem [resolvable:$false] %s761_s27 }
  0x44   : > { %s763_s4 = scalar_lea.vmem %s762_s27, 12288  ;;  %p764_p5 = scmp.lt.s32.totalorder %s1005_s7, %s762_s27 }
  0x45   : > { %p759_p13 = pnand %p757_p12, %p743_p3  ;;  %p765_p9 = scmp.lt.s32.totalorder %s763_s4, %s756_s30 }
  0x47   : > { %p760_p0 = pneg %p759_p13  ;;  %p766_p1 = por %p765_p9, %p764_p5 }
  0x49   : > { %p767_p2 = pnand %p766_p1, %p760_p0 }
  0x4b   : > { %770 = shalt.err (!%p767_p2)
}
  0x4c   : > { %648 = dma.hbm_to_vmem [thread:$0]  (!%p996_p11), %s1003_s18, 6144, %s1005_s7, %s1007_s19, %s860_s10, %s860_s10, %s861_s11  }
  0x4d   : > { %p1190_p3 = scmp.ne.s32.totalorder %s1185_s24, 0 }
  0x4e   : > { %p1191_p7 = scmp.ne.s32.totalorder (!%p1190_p3), %s1181_s20, 0 }
  0x4f   : > { %218 = sbr.rel (%p1190_p3) target bundleno = 394 (0x18a), region = 32 }
  0x56   : > { %824 = dma.done.wait (%p1191_p7), [#allocation4], 768  }
  0x57   : > { %826 = vsyncadd (%p1191_p7), [#allocation4], 4294966528  ;;  %s1045_s25 = sand.u32 1, %s841_s13   ;;  %p1192_p11 = scmp.ne.s32.totalorder %s1183_s22, 0 }
  0x58   : > { %s632_s8 = smul.u32 384, %s1045_s25  ;;  %s225_s26 = scalar_lea.sflag [#allocation7], %s1045_s25 }
  0x5a   : > { %s1049_s6 = scalar_lea.vmem [#allocation6], %s632_s8 }
  0x5b   : > { %828 = dma.done.wait (%p1192_p11), %s225_s26, 6144  }
  0x5c   : > { %830 = vsyncadd (%p1192_p11), %s225_s26, 4294961152  ;;  %v863_v0 = vmov 0.0   ;;  %vm864_vm0 = vmmov 0   ;;  %v276_v1 = vld [vmem:[%s1049_s6 + $0x8] sm:$0xff]  ;;  %v279_v2 = vld [vmem:[%s1049_s6 + $0x20] sm:$0xff]  ;;  %p258_p4 = scmp.lt.s32.totalorder %s849_s15, 1 }
  0x5d   : > { %610 = vmatprep.subr.bf16.mxu1 %v863_v0  ;;  %626 = vmatprep.mubr.msk.bf16.mxu1 %vm864_vm0, %v863_v0  ;;  %v277_v3 = vld [vmem:[%s1049_s6 + $0x10] sm:$0xff]  ;;  %v327_v4 = vpack.c.bf16 %v279_v2, %v276_v1  ;;  %v280_v5 = vld [vmem:[%s1049_s6 + $0x28] sm:$0xff]  ;;  %v275_v6 = vld [vmem:[%s1049_s6] sm:$0xff]  ;;  %s595_s22 = sshll.u32 %s1045_s25, 4  ;;  %s598_s19 = sshll.u32 %s849_s15, 7 }
  0x5e   : > { %v278_v7 = vld [vmem:[%s1049_s6 + $0x18] sm:$0xff]  ;;  %v328_v8 = vpack.c.bf16 %v280_v5, %v277_v3  ;;  %v285_v11 = vld [vmem:[%s1049_s6 + $0x50] sm:$0xff]  ;;  %v283_v13 = vld [vmem:[%s1049_s6 + $0x40] sm:$0xff]  ;;  %s259_s20 = scalar_select %p258_p4, %s849_s15, 1 }
  0x5f   : > { %v326_v9 = vpack.c.bf16 %v278_v7, %v275_v6  ;;  %v282_v10 = vld [vmem:[%s1049_s6 + $0x38] sm:$0xff]  ;;  %352 = vmatprep.subr.bf16.mxu0 %v327_v4  ;;  %v281_v15 = vld [vmem:[%s1049_s6 + $0x30] sm:$0xff]  ;;  %v284_v16 = vld [vmem:[%s1049_s6 + $0x48] sm:$0xff]  ;;  %s253_s7 = scalar_lea.vmem [#allocation8], %s595_s22  ;;  %s1124_s21 = scalar_lea.hbm %s1176_s3, %s598_s19 }
  0x60   : > { %v330_v12 = vpack.c.bf16 %v285_v11, %v282_v10  ;;  %611 = vmatpush3.bf16.xpose.msra.mxu1 %v328_v8  ;;  %v286_v14 = vld [vmem:[%s1049_s6 + $0x58] sm:$0xff]  ;;  %v288_v17 = vld [vmem:[%s1049_s6 + $0x68] sm:$0xff]  ;;  %v291_v18 = vld [vmem:[%s1049_s6 + $0x80] sm:$0xff]  ;;  %v329_v20 = vpack.c.bf16 %v284_v16, %v281_v15  ;;  %s260_s11 = scalar_lea.vmem %s1175_s2, %s259_s20  ;;  %s470_s18 = sshll.u32 %s253_s7, 4  ;;  %s1119_s18 = int_to_ptr.vmem [resolvable:$true] %s470_s18 }
  0x61   : > { %353 = vmatpush1.bf16.xpose.msra.mxu0 %v326_v9  ;;  %612 = vmatprep.subr.bf16.mxu1 %v863_v0  ;;  %v331_v19 = vpack.c.bf16 %v286_v14, %v283_v13  ;;  %v333_v21 = vpack.c.bf16 %v291_v18, %v288_v17  ;;  %v289_v22 = vld [vmem:[%s1049_s6 + $0x70] sm:$0xff]  ;;  %v292_v23 = vld [vmem:[%s1049_s6 + $0x88] sm:$0xff]  ;;  %v287_v24 = vld [vmem:[%s1049_s6 + $0x60] sm:$0xff]  ;;  %s455_s15 = scalar_lea.sflag [#allocation5], %s1045_s25  ;;  %s771_s27 = scalar_lea.vmem %s1119_s18, 256 }
  0x62   : > { %354 = vmatprep.subr.bf16.mxu0 %v330_v12  ;;  %v290_v25 = vld [vmem:[%s1049_s6 + $0x78] sm:$0xff]  ;;  %v297_v27 = vld [vmem:[%s1049_s6 + $0xb0] sm:$0xff]  ;;  %v334_v28 = vpack.c.bf16 %v292_v23, %v289_v22  ;;  %v295_v34 = vld [vmem:[%s1049_s6 + $0xa0] sm:$0xff]  ;;  %p772_p6 = scmp.ne.s32.totalorder %s1119_s18, %s771_s27  ;;  %s865_s4 = smov [#allocation8]  }
  0x63   : > { %v294_v26 = vld [vmem:[%s1049_s6 + $0x98] sm:$0xff]  ;;  %v332_v29 = vpack.c.bf16 %v290_v25, %v287_v24  ;;  %v273_v31 = vld [vmem:[#allocation3 + $0x20] sm:$0xff]  ;;  %v296_v37 = vld [vmem:[%s1049_s6 + $0xa8] sm:$0xff]  ;;  %s775_s8 = sshll.u32 %s865_s4, 4  ;;  %s776_s8 = int_to_ptr.vmem [resolvable:$false] %s775_s8 }
  0x64   : > { %v270_v30 = vld [vmem:[#allocation3 + $0x8] sm:$0xff]  ;;  %v336_v32 = vpack.c.bf16 %v297_v27, %v294_v26  ;;  %v293_v36 = vld [vmem:[%s1049_s6 + $0x90] sm:$0xff]  ;;  %v300_v38 = vld [vmem:[%s1049_s6 + $0xc8] sm:$0xff]  ;;  %p773_p8 = pnand %p772_p6, %p984_p10  ;;  %s777_s26 = scalar_lea.vmem %s776_s8, 512 }
  0x65   : > { %v324_v33 = vpack.c.bf16 %v273_v31, %v270_v30  ;;  %v298_v35 = vld [vmem:[%s1049_s6 + $0xb8] sm:$0xff]  ;;  %v303_v39 = vld [vmem:[%s1049_s6 + $0xe0] sm:$0xff]  ;;  %v335_v41 = vpack.c.bf16 %v296_v37, %v293_v36  ;;  %v301_v43 = vld [vmem:[%s1049_s6 + $0xd0] sm:$0xff]  ;;  %p778_p13 = scmp.lt.s32.totalorder %s1119_s18, %s776_s8  ;;  %p779_p0 = scmp.lt.s32.totalorder %s777_s26, %s771_s27 }
  0x66   : > { %v337_v40 = vpack.c.bf16 %v298_v35, %v295_v34  ;;  %v339_v42 = vpack.c.bf16 %v303_v39, %v300_v38  ;;  %v304_v44 = vld [vmem:[%s1049_s6 + $0xe8] sm:$0xff]  ;;  %v299_v45 = vld [vmem:[%s1049_s6 + $0xc0] sm:$0xff]  ;;  %v302_v46 = vld [vmem:[%s1049_s6 + $0xd8] sm:$0xff]  ;;  %p774_p12 = pneg %p773_p8 }
  0x67   : > { %384 = vmatprep.mubr.bf16.mxu0 %v324_v33  ;;  %v306_v47 = vld [vmem:[%s1049_s6 + $0xf8] sm:$0xff]  ;;  %v309_v48 = vld [vmem:[%s1049_s6 + $0x110] sm:$0xff]  ;;  %v340_v49 = vpack.c.bf16 %v304_v44, %v301_v43  ;;  %v338_v50 = vpack.c.bf16 %v302_v46, %v299_v45  ;;  %v307_v52 = vld [vmem:[%s1049_s6 + $0x100] sm:$0xff]  ;;  %p780_p5 = por %p779_p0, %p778_p13 }
  0x68   : > { %613 = vmatpush3.bf16.xpose.msra.mxu1 %v331_v19  ;;  %v342_v51 = vpack.c.bf16 %v309_v48, %v306_v47  ;;  %v310_v53 = vld [vmem:[%s1049_s6 + $0x118] sm:$0xff]  ;;  %v305_v54 = vld [vmem:[%s1049_s6 + $0xf0] sm:$0xff]  ;;  %v308_v55 = vld [vmem:[%s1049_s6 + $0x108] sm:$0xff] }
  0x69   : > { %355 = vmatpush1.bf16.xpose.msra.mxu0 %v329_v20  ;;  %614 = vmatprep.subr.bf16.mxu1 %v863_v0  ;;  %v312_v56 = vld [vmem:[%s1049_s6 + $0x128] sm:$0xff]  ;;  %v315_v57 = vld [vmem:[%s1049_s6 + $0x140] sm:$0xff]  ;;  %v343_v58 = vpack.c.bf16 %v310_v53, %v307_v52  ;;  %v341_v59 = vpack.c.bf16 %v308_v55, %v305_v54  ;;  %v313_v61 = vld [vmem:[%s1049_s6 + $0x130] sm:$0xff]  ;;  %p781_p9 = pnand %p780_p5, %p774_p12 }
  0x6a   : > { %356 = vmatprep.subr.bf16.mxu0 %v333_v21  ;;  %v345_v60 = vpack.c.bf16 %v315_v57, %v312_v56  ;;  %v316_v62 = vld [vmem:[%s1049_s6 + $0x148] sm:$0xff]  ;;  %v311_v63 = vld [vmem:[%s1049_s6 + $0x120] sm:$0xff]  ;;  %v314_v1 = vld [vmem:[%s1049_s6 + $0x138] sm:$0xff] }
  0x6b   : > { %v318_v2 = vld [vmem:[%s1049_s6 + $0x158] sm:$0xff]  ;;  %v321_v3 = vld [vmem:[%s1049_s6 + $0x170] sm:$0xff]  ;;  %v346_v4 = vpack.c.bf16 %v316_v62, %v313_v61  ;;  %v344_v5 = vpack.c.bf16 %v314_v1, %v311_v63  ;;  %v319_v7 = vld [vmem:[%s1049_s6 + $0x160] sm:$0xff] }
  0x6c   : > { %v348_v6 = vpack.c.bf16 %v321_v3, %v318_v2  ;;  %v322_v8 = vld [vmem:[%s1049_s6 + $0x178] sm:$0xff]  ;;  %v317_v9 = vld [vmem:[%s1049_s6 + $0x150] sm:$0xff]  ;;  %v320_v10 = vld [vmem:[%s1049_s6 + $0x168] sm:$0xff] }
  0x6d   : > { %v349_v11 = vpack.c.bf16 %v322_v8, %v319_v7  ;;  %v347_v12 = vpack.c.bf16 %v320_v10, %v317_v9  ;;  %v271_v13 = vld [vmem:[#allocation3 + $0x10] sm:$0xff]  ;;  %v274_v14 = vld [vmem:[#allocation3 + $0x28] sm:$0xff]  ;;  %v269_v15 = vld [vmem:[#allocation3] sm:$0xff] }
  0x6e   : > { %v272_v16 = vld [vmem:[#allocation3 + $0x18] sm:$0xff]  ;;  %v325_v17 = vpack.c.bf16 %v274_v14, %v271_v13  ;;  %v596_v20 = vld [vmem:[%s260_s11] ss:$0 sm:$0xff] }
  0x6f   : > { %v323_v18 = vpack.c.bf16 %v272_v16, %v269_v15 }
  0x70   : > { %615 = vmatpush3.bf16.xpose.msra.mxu1 %v334_v28 }
  0x71   : > { %357 = vmatpush1.bf16.xpose.msra.mxu0 %v332_v29  ;;  %616 = vmatprep.subr.bf16.mxu1 %v863_v0 }
  0x72   : > { %358 = vmatprep.subr.bf16.mxu0 %v336_v32 }
  0x78   : > { %617 = vmatpush3.bf16.xpose.msra.mxu1 %v337_v40 }
  0x79   : > { %359 = vmatpush1.bf16.xpose.msra.mxu0 %v335_v41  ;;  %618 = vmatprep.subr.bf16.mxu1 %v863_v0 }
  0x7a   : > { %360 = vmatprep.subr.bf16.mxu0 %v339_v42 }
  0x80   : > { %619 = vmatpush3.bf16.xpose.msra.mxu1 %v340_v49 }
  0x81   : > { %361 = vmatpush1.bf16.xpose.msra.mxu0 %v338_v50  ;;  %620 = vmatprep.subr.bf16.mxu1 %v863_v0 }
  0x82   : > { %362 = vmatprep.subr.bf16.mxu0 %v342_v51 }
  0x88   : > { %621 = vmatpush3.bf16.xpose.msra.mxu1 %v343_v58 }
  0x89   : > { %363 = vmatpush1.bf16.xpose.msra.mxu0 %v341_v59  ;;  %622 = vmatprep.subr.bf16.mxu1 %v863_v0 }
  0x8a   : > { %364 = vmatprep.subr.bf16.mxu0 %v345_v60 }
  0x90   : > { %623 = vmatpush3.bf16.xpose.msra.mxu1 %v346_v4 }
  0x91   : > { %365 = vmatpush1.bf16.xpose.msra.mxu0 %v344_v5  ;;  %624 = vmatprep.subr.bf16.mxu1 %v863_v0 }
  0x92   : > { %366 = vmatprep.subr.bf16.mxu0 %v348_v6 }
  0x98   : > { %625 = vmatpush3.bf16.xpose.msra.mxu1 %v349_v11 }
  0x99   : > { %367 = vmatpush1.bf16.xpose.msra.mxu0 %v347_v12 }
  0x9f   : > { %627 = vmatmul.mubr.bf16.vlgmr.msra.gmra.mrb[0].mxu1 %v325_v17 }
  0xa0   : > { %385 = vmatmul.mubr.bf16.vlgmr.msra.gmra.mrb[0].mxu0 %v323_v18 }
 0x172   : > { %v427_v0 = vpop.f32.mrb[0].mxu1 }
 0x173   : > { %v386_v19 = vpop.f32.mrb[0].mxu0  ;;  %v628_v22 = vpop.f32.mrb[1].mxu1 }
 0x174   : > { %v428_v21 = vadd.f32 %v427_v0, %v386_v19  ;;  %v388_v23 = vpop.f32.mrb[1].mxu0  ;;  %v430_v24 = vpop.f32.mrb[2].mxu1 }
 0x175   : > { %v389_v25 = vpop.f32.mrb[2].mxu0  ;;  %v629_v28 = vpop.f32.mrb[3].mxu1 }
 0x176   : > { %v450_v26 = vadd.f32 %v596_v20, %v428_v21  ;;  %v431_v27 = vadd.f32 %v430_v24, %v389_v25  ;;  %v391_v29 = vpop.f32.mrb[3].mxu0 }
 0x178   : > { %452 = vst [vmem:[%s253_s7] sm:$0xff] %v450_v26  ;;  %v451_v30 = vadd.f32 %v596_v20, %v431_v27 }
 0x17a   : > { %453 = vst [vmem:[%s253_s7 + $0x8] sm:$0xff] %v451_v30 }
 0x17b   : > { %784 = shalt.err (!%p781_p9)
}
 0x17c   : > { %s785_s6 = scalar_lea.hbm %s1124_s21, 256  ;;  %s789_s24 = scalar_lea.hbm %s1176_s3, 512 }
 0x17d   : > { %p786_p1 = scmp.ne.s32.totalorder %s1124_s21, %s785_s6  ;;  %p790_p7 = scmp.lt.u32.totalorder %s1124_s21, %s1176_s3 }
 0x17e   : > { %p791_p11 = scmp.lt.u32.totalorder %s789_s24, %s785_s6  ;;  %p793_p6 = scmp.lt.u32.totalorder %s785_s6, %s1124_s21 }
 0x17f   : > { %p787_p2 = pnand %p786_p1, %p984_p10 }
 0x180   : > { %p792_p4 = por %p791_p11, %p790_p7 }
 0x181   : > { %p788_p3 = pneg %p787_p2 }
 0x182   : > { %p794_p8 = por %p793_p6, %p792_p4 }
 0x184   : > { %p795_p12 = pnand %p794_p8, %p788_p3 }
 0x186   : > { %798 = shalt.err (!%p795_p12)
}
 0x187   : > { %s866_s7 = smov 128   ;;  %s867_s19 = smov 256  }
 0x188   : > { %s868_s9 = smov 8  }
 0x189   : > { %639 = dma.vmem_to_hbm [thread:$0]  (%p984_p10), %s1119_s18, 256, %s1124_s21, %s455_s15, %s866_s7, %s867_s19, %s868_s9  }
 0x18a PF: > { %s485_s30 = sand.u32 1, %s837_s12   ;;  %p1193_p13 = scmp.ne.s32.totalorder %s1184_s23, 0 }
 0x18b   : > { %p1194_p0 = scmp.ge.s32.totalorder %s857_s17, 2  ;;  %s486_s27 = scalar_lea.sflag [#allocation5], %s485_s30 }
 0x18d   : > { %p650_p5 = pnand %p1194_p0, %p1193_p13 }
 0x18f   : > { %832 = dma.done.wait (!%p650_p5), %s486_s27, 256  }
 0x190   : > { %834 = vsyncadd (!%p650_p5), %s486_s27, 4294967040  ;;  %s20_s17 = sadd.s32 1, %s857_s17   ;;  %s1195_s12 = smov %s841_s13 }
 0x191   : > { %p17_p9 = scmp.ge.s32.totalorder %s20_s17, 4   ;;  %s1196_s13 = smov %s845_s14 }
 0x192   : > { %s1197_s14 = smov %s993_s5  ;;  %s1198_s15 = smov %s853_s16 }
 0x193   : > { %s1199_s16 = smov %s1201_s28  ;;  %19 = sbr.rel (!%p17_p9) target bundleno = 7 (0x7), region = 94 }
 0x19a   :  { %491 = vsyncpa [#allocation4], 1 }
 0x19b   :  { %493 = vsyncpa [#allocation4 + $0x1], 1 }
 0x19c   :  { %494 = vsyncpa [#allocation7], 1 }
 0x19d   :  { %496 = vsyncpa [#allocation7 + $0x1], 1 }
 0x19e   :  { %497 = vsyncpa [#allocation5], 1 }
 0x19f   :  { %499 = vsyncpa [#allocation5 + $0x1], 1 }

</bundles_post_ra>
